<compile_context>
chip_gen: v7x
topology: tpu7x:2x2x1
jax: 0.10.0
libtpu: 0.0.40
codegen_flags: <defaults>
</compile_context>

<pallas_src>
import jax
import jax.numpy as jnp
from jax.experimental import pallas as pl
from jax.experimental.pallas import tpu as pltpu


def conv_pool_add_kernel(x_ref, w_ref, b_ref, pad_ref, o_ref):
    """x_ref:   (4*Cin, TM)  parity-major padded-input tile
       w_ref:   (Cout, 4*Cin) pre-tiled conv weight, already scaled by 1/4
       b_ref:   (Cout, 1)     conv bias
       pad_ref: (Cout, TM)    `padding2` tile (channel-major, flattened)
       o_ref:   (Cout, TM)    result tile
    """
    o_ref[...] = (
        jnp.dot(w_ref[...], x_ref[...], preferred_element_type=jnp.float32)
        + b_ref[...]
        + pad_ref[...]
    )


def _round_up(x, m):
    return ((x + m - 1) // m) * m


@jax.jit
def model_forward(x, w, b, padding2):
    """x: (N, Cin, H, W) f32 NCHW; w: (Cout, Cin); b: (Cout,);
       padding2: (N, Cout, Ho, Wo).  Returns (N, Cout, Ho, Wo)."""
    N, Cin, H, W = x.shape
    Cout = w.shape[0]

    # Conv padding=1 (kernel_size=1) -> zero-pad spatial dims by 1.
    xp = jnp.pad(x, ((0, 0), (0, 0), (1, 1), (1, 1)))
    Hp, Wp = H + 2, W + 2
    Ho, Wo = Hp // 2, Wp // 2
    # AvgPool2d(2,2) floors odd spatial dims; crop so the reshape split is exact.
    if (Hp % 2) or (Wp % 2):
        xp = xp[:, :, : 2 * Ho, : 2 * Wo]
    M = N * Ho * Wo

    # Parity split of every 2x2 pooling window, parity-major on the first axis:
    # (N,Cin,2Ho,2Wo) -> (N,Cin,Ho,2,Wo,2) -> (2,2,Cin,N,Ho,Wo) -> (4*Cin, M)
    xs = xp.reshape(N, Cin, Ho, 2, Wo, 2)
    xs = jnp.transpose(xs, (3, 5, 1, 0, 2, 4)).reshape(4 * Cin, M)

    # padding2 in channel-major flattened layout (Cout, M).
    pad_cm = jnp.transpose(padding2, (1, 0, 2, 3)).reshape(Cout, M)

    # Lane-pad M to a multiple of 128 (and of the tile size TM).
    M128 = _round_up(M, 128)
    TM = M128 if M128 <= 2048 else 1024
    Mp = _round_up(M128, TM)
    if Mp != M:
        xs = jnp.pad(xs, ((0, 0), (0, Mp - M)))
        pad_cm = jnp.pad(pad_cm, ((0, 0), (0, Mp - M)))

    # Fold the 2x2-average (1/4) into a pre-tiled weight (trace-time constant).
    w4 = jnp.tile(w, (1, 4)) * 0.25          # (Cout, 4*Cin)
    b2 = b.reshape(Cout, 1)

    out = pl.pallas_call(
        conv_pool_add_kernel,
        out_shape=jax.ShapeDtypeStruct((Cout, Mp), jnp.float32),
        grid=(Mp // TM,),
        in_specs=[
            pl.BlockSpec((4 * Cin, TM), lambda i: (0, i)),     # xs tile
            pl.BlockSpec((Cout, 4 * Cin), lambda i: (0, 0)),   # w4 (whole)
            pl.BlockSpec((Cout, 1), lambda i: (0, 0)),         # bias (whole)
            pl.BlockSpec((Cout, TM), lambda i: (0, i)),        # padding2 tile
        ],
        out_specs=pl.BlockSpec((Cout, TM), lambda i: (0, i)),
        compiler_params=pltpu.CompilerParams(
            dimension_semantics=("parallel",)),
    )(xs, w4, b2, pad_cm)

    # Crop the lane padding and restore NCHW.
    return out[:, :M].reshape(Cout, N, Ho, Wo).transpose(1, 0, 2, 3)


def reference_forward(x, w, b, padding2):
    """Plain-JAX reference (1x1 conv w/ padding=1, avgpool 2x2, add)."""
    xp = jnp.pad(x, ((0, 0), (0, 0), (1, 1), (1, 1)))
    y = jnp.einsum('nchw,oc->nohw', xp, w) + b[None, :, None, None]
    N, Cout, Hp, Wp = y.shape
    y = y.reshape(N, Cout, Hp // 2, 2, Wp // 2, 2).mean(axis=(3, 5))
    return y + padding2


if __name__ == "__main__":
    key = jax.random.PRNGKey(0)
    k_x, k_w, k_b, k_pad = jax.random.split(key, 4)

    # Shapes from the module spec: x1 = torch.randn(1, 3, 64, 64).
    N, Cin, Cout, H, W = 1, 3, 10, 64, 64
    Ho, Wo = (H + 2) // 2, (W + 2) // 2

    x = jax.random.normal(k_x, (N, Cin, H, W), dtype=jnp.float32)

    # Conv2d(3, 10, 1) parameter init (kernel_size=1 -> weight stored (Cout, Cin)).
    fan_in = Cin  # Cin * 1 * 1
    bound = 1.0 / (fan_in ** 0.5)
    w = jax.random.uniform(k_w, (Cout, Cin), jnp.float32, -bound, bound)
    b = jax.random.uniform(k_b, (Cout,), jnp.float32, -bound, bound)

    # padding2 defaults to torch.randn(v1.shape) in the module; generate it
    # deterministically here and feed it to both kernel and reference.
    padding2 = jax.random.normal(k_pad, (N, Cout, Ho, Wo), dtype=jnp.float32)

    out = model_forward(x, w, b, padding2)
    out = jax.block_until_ready(out)

    ref = reference_forward(x, w, b, padding2)
    assert out.shape == (N, Cout, Ho, Wo)
    assert jnp.allclose(out, ref, atol=1e-5, rtol=1e-5)

    print("KERNEL_OK")
</pallas_src>

<mosaic_0001>
module attributes {stable_mosaic.version = 11 : i64} {
  func.func @conv_pool_add_kernel(%arg0: i32, %arg1: memref<12x1152xf32, #tpu.memory_space<vmem>>, %arg2: memref<10x12xf32, #tpu.memory_space<vmem>>, %arg3: memref<10x1xf32, #tpu.memory_space<vmem>>, %arg4: memref<10x1152xf32, #tpu.memory_space<vmem>>, %arg5: memref<10x1152xf32, #tpu.memory_space<vmem>>) attributes {dimension_semantics = [#tpu.dimension_semantics<parallel>], iteration_bounds = array<i64: 1>, scalar_prefetch = 0 : i64, scratch_operands = 0 : i64, tpu.core_type = #tpu.core_type<tc>, window_params = [{transform_indices = @transform_0, window_bounds = array<i64: 12, 1152>}, {pipeline_mode = #tpu.pipeline_mode<synchronous>, transform_indices = @transform_1, window_bounds = array<i64: 10, 12>}, {pipeline_mode = #tpu.pipeline_mode<synchronous>, transform_indices = @transform_2, window_bounds = array<i64: 10, 1>}, {transform_indices = @transform_3, window_bounds = array<i64: 10, 1152>}, {transform_indices = @transform_4, window_bounds = array<i64: 10, 1152>}]} {
    %c0 = arith.constant 0 : index
    %c0_0 = arith.constant 0 : index
    %0 = vector.load %arg2[%c0, %c0_0] : memref<10x12xf32, #tpu.memory_space<vmem>>, vector<10x12xf32>
    %c0_1 = arith.constant 0 : index
    %c0_2 = arith.constant 0 : index
    %1 = vector.load %arg1[%c0_1, %c0_2] : memref<12x1152xf32, #tpu.memory_space<vmem>>, vector<12x1152xf32>
    %cst = arith.constant dense<0.000000e+00> : vector<10x1152xf32>
    %2 = tpu.matmul %0, %1, %cst {dimension_numbers = #tpu.dot_dimension_numbers<[1], [0], [0], [1], [0, 0, 1, 1], [], []>} : vector<10x12xf32>, vector<12x1152xf32>, vector<10x1152xf32> -> vector<10x1152xf32>
    %c0_3 = arith.constant 0 : index
    %c0_4 = arith.constant 0 : index
    %3 = vector.load %arg3[%c0_3, %c0_4] : memref<10x1xf32, #tpu.memory_space<vmem>>, vector<10x1xf32>
    %4 = vector.broadcast %3 : vector<10x1xf32> to vector<10x1152xf32>
    %5 = arith.addf %2, %4 : vector<10x1152xf32>
    %c0_5 = arith.constant 0 : index
    %c0_6 = arith.constant 0 : index
    %6 = vector.load %arg4[%c0_5, %c0_6] : memref<10x1152xf32, #tpu.memory_space<vmem>>, vector<10x1152xf32>
    %7 = arith.addf %5, %6 : vector<10x1152xf32>
    %c0_7 = arith.constant 0 : index
    %c0_8 = arith.constant 0 : index
    %8 = vector.load %arg5[%c0_7, %c0_8] : memref<10x1152xf32, #tpu.memory_space<vmem>>, vector<10x1152xf32>
    tpu.vector_store %arg5[%c0_7, %c0_8], %7 {strides = array<i32>} : memref<10x1152xf32, #tpu.memory_space<vmem>>, vector<10x1152xf32>,
    return
  }
  func.func @transform_0(%arg0: i32) -> (i32, i32) {
    %c0_i32 = arith.constant 0 : i32
    %c0_i32_0 = arith.constant 0 : i32
    return %c0_i32, %arg0 : i32, i32
  }
  func.func @transform_1(%arg0: i32) -> (i32, i32) {
    %c0_i32 = arith.constant 0 : i32
    %c0_i32_0 = arith.constant 0 : i32
    %c0_i32_1 = arith.constant 0 : i32
    return %c0_i32, %c0_i32_0 : i32, i32
  }
  func.func @transform_2(%arg0: i32) -> (i32, i32) {
    %c0_i32 = arith.constant 0 : i32
    %c0_i32_0 = arith.constant 0 : i32
    %c0_i32_1 = arith.constant 0 : i32
    return %c0_i32, %c0_i32_0 : i32, i32
  }
  func.func @transform_3(%arg0: i32) -> (i32, i32) {
    %c0_i32 = arith.constant 0 : i32
    %c0_i32_0 = arith.constant 0 : i32
    return %c0_i32, %arg0 : i32, i32
  }
  func.func @transform_4(%arg0: i32) -> (i32, i32) {
    %c0_i32 = arith.constant 0 : i32
    %c0_i32_0 = arith.constant 0 : i32
    return %c0_i32, %arg0 : i32, i32
  }
}

</mosaic_0001>

<bundles_post_ra>
// kernel: model_forward.1
= control target key start
LH: loop header
LB: loop body
LE: loop exit
PB: predicated region body
PF: predicated region fallthrough
CT: control target
= control target key end

     0   :  { %vm56_vm0 = vcmask 1043456   ;;  %vm589_vm1 = vmmov 1   ;;  %v590_v3 = vmov 0.0   ;;  %v591_v8 = vmov 0   ;;  %s847_s0 = inlined_call_operand.vmem [shape: f32[12,1152], index: 0, kind: input, shape index: {}]   ;;  %s848_s1 = inlined_call_operand.vmem [shape: f32[10,12], index: 1, kind: input, shape index: {}]   ;;  %s849_s2 = inlined_call_operand.vmem [shape: f32[10,1], index: 2, kind: input, shape index: {}]   ;;  %s850_s3 = inlined_call_operand.vmem [shape: f32[10,1152], index: 3, kind: input, shape index: {}]   ;;  %s851_s4 = inlined_call_operand.vmem [shape: f32[10,1152], index: 4, kind: output, shape index: {}]  }
   0x1   :  { %v20_v0 = vld [vmem:[%s847_s0 + $0x8] sm:$0xff]  ;;  %v29_v1 = vld [vmem:[%s847_s0 + $0x50] sm:$0xf]  ;;  %vm623_vm2 = vmpackc.low %vm56_vm0, %vm589_vm1  ;;  %148 = vmatprep.mubr.f32.mxu0 %v590_v3  ;;  %225 = vmatprep.mubr.f32.mxu1 %v590_v3  ;;  %vm49_vm3 = vcmask 97280  }
   0x2   :  { %v555_v4 = vpack.c.bf16 %v29_v1, %v20_v0  ;;  %v19_v5 = vld [vmem:[%s847_s0] sm:$0xff]  ;;  %v28_v6 = vld [vmem:[%s847_s0 + $0x48] sm:$0xf]  ;;  %v22_v7 = vld [vmem:[%s847_s0 + $0x18] sm:$0xff]  ;;  %588 = vset.pattern.permute.xlu0 %v591_v8 }
   0x3   :  { %v558_v9 = vpack.c.bf16 %v28_v6, %v19_v5  ;;  %v31_v10 = vld [vmem:[%s847_s0 + $0x60] sm:$0xf]  ;;  %v21_v11 = vld [vmem:[%s847_s0 + $0x10] sm:$0xff]  ;;  %v30_v12 = vld [vmem:[%s847_s0 + $0x58] sm:$0xf] }
   0x4   :  { %557 = vmatprep.subr.msk.bf16.mxu0 %vm623_vm2, %v555_v4  ;;  %v561_v13 = vpack.c.bf16 %v31_v10, %v22_v7  ;;  %v564_v14 = vpack.c.bf16 %v30_v12, %v21_v11  ;;  %v24_v15 = vld [vmem:[%s847_s0 + $0x28] sm:$0xff]  ;;  %v33_v16 = vld [vmem:[%s847_s0 + $0x70] sm:$0xf]  ;;  %v17_v17 = vld [vmem:[%s848_s1] sm:$0xff] }
   0x5   :  { %560 = vmatpush1.bf16.msk.msra.mxu0 %vm623_vm2, %v558_v9  ;;  %v567_v18 = vpack.c.bf16 %v33_v16, %v24_v15  ;;  %v23_v19 = vld [vmem:[%s847_s0 + $0x20] sm:$0xff]  ;;  %v32_v20 = vld [vmem:[%s847_s0 + $0x68] sm:$0xf]  ;;  %v26_v22 = vld [vmem:[%s847_s0 + $0x38] sm:$0xff] }
   0x6   :  { %563 = vmatprep.subr.msk.bf16.mxu1 %vm623_vm2, %v561_v13  ;;  %v570_v21 = vpack.c.bf16 %v32_v20, %v23_v19  ;;  %v35_v23 = vld [vmem:[%s847_s0 + $0x80] sm:$0xf]  ;;  %v25_v24 = vld [vmem:[%s847_s0 + $0x30] sm:$0xff]  ;;  %v34_v26 = vld [vmem:[%s847_s0 + $0x78] sm:$0xf] }
   0x7   :  { %566 = vmatpush1.bf16.msk.msra.mxu1 %vm623_vm2, %v564_v14  ;;  %569 = vmatprep.subr.msk.bf16.mxu0 %vm623_vm2, %v567_v18  ;;  %v573_v25 = vpack.c.bf16 %v35_v23, %v26_v22  ;;  %v27_v27 = vld [vmem:[%s847_s0 + $0x40] sm:$0xff]  ;;  %v36_v28 = vld [vmem:[%s847_s0 + $0x88] sm:$0xf]  ;;  %v576_v29 = vpack.c.bf16 %v34_v26, %v25_v24  ;;  %v469_v42 = vld [vmem:[%s850_s3 + $0x10] sm:$0xff] }
   0x8   :  { %527 = vmatmul.mubr.msk.f32.vlgmr.msra.gmra.mrb[0].mxu0 %vm49_vm3, %v17_v17  ;;  %v579_v30 = vpack.c.bf16 %v36_v28, %v27_v27  ;;  %v18_v31 = vld [vmem:[%s848_s1 + $0x8] sm:$0x3]  ;;  %v37_v32 = vld [vmem:[%s849_s2] sm:$0xff]  ;;  %v470_v47 = vld [vmem:[%s850_s3 + $0x18] sm:$0xff] }
   0x9   :  { %572 = vmatpush1.bf16.msk.msra.mxu0 %vm623_vm2, %v570_v21  ;;  %154 = vmatprep.mubr.f32.mxu0 %v590_v3  ;;  %v38_v33 = vld [vmem:[%s849_s2 + $0x8] sm:$0x3]  ;;  %v467_v36 = vld [vmem:[%s850_s3] sm:$0xff]  ;;  %v477_v55 = vld [vmem:[%s850_s3 + $0x50] sm:$0x3] }
   0xa   :  { %531 = vmatmul.mubr.msk.f32.vlgmr.msra.gmra.mrb[0].mxu1 %vm49_vm3, %v17_v17  ;;  %575 = vmatprep.subr.msk.bf16.mxu1 %vm623_vm2, %v573_v25  ;;  %v468_v39 = vld [vmem:[%s850_s3 + $0x8] sm:$0xff]  ;;  %v478_v59 = vld [vmem:[%s850_s3 + $0x58] sm:$0x3]  ;;  %v479_v63 = vld [vmem:[%s850_s3 + $0x60] sm:$0x3] }
   0xb   :  { %231 = vmatprep.mubr.f32.mxu1 %v590_v3  ;;  %578 = vmatpush1.bf16.msk.msra.mxu1 %vm623_vm2, %v576_v29  ;;  %v476_v50 = vld [vmem:[%s850_s3 + $0x48] sm:$0x3]  ;;  %v471_v2 = vld [vmem:[%s850_s3 + $0x20] sm:$0xff]  ;;  %v473_v11 = vld [vmem:[%s850_s3 + $0x30] sm:$0xff] }
   0xc   :  { %528 = vmatmul.mubr.msk.f32.gmra.mrb[2].mxu0 %vm49_vm3, %v18_v31  ;;  %581 = vmatprep.subr.msk.bf16.mxu0 %vm623_vm2, %v579_v30  ;;  %v472_v7 = vld [vmem:[%s850_s3 + $0x28] sm:$0xff]  ;;  %v474_v15 = vld [vmem:[%s850_s3 + $0x38] sm:$0xff]  ;;  %v481_v23 = vld [vmem:[%s850_s3 + $0x70] sm:$0x3] }
   0xd   :  { %302 = vmatprep.mubr.f32.mxu0 %v590_v3  ;;  %41 = vperm.xlu0 %588, %v37_v32   ;;  %v480_v18 = vld [vmem:[%s850_s3 + $0x68] sm:$0x3]  ;;  %v482_v27 = vld [vmem:[%s850_s3 + $0x78] sm:$0x3] }
   0xe   :  { %532 = vmatmul.mubr.msk.f32.gmra.mrb[2].mxu1 %vm49_vm3, %v18_v31 }
   0xf   :  { %379 = vmatprep.mubr.f32.mxu1 %v590_v3 }
  0x10   :  { %535 = vmatmul.mubr.msk.f32.vlgmr.msra.gmra.mrb[4].mxu0 %vm49_vm3, %v17_v17 }
  0x11   :  { %584 = vmatpush3.bf16.msk.msra.mxu0 %vm623_vm2, %v579_v30  ;;  %308 = vmatprep.mubr.f32.mxu0 %v590_v3 }
  0x12   :  { %539 = vmatmul.mubr.msk.f32.vlgmr.msra.gmra.mrb[4].mxu1 %vm49_vm3, %v17_v17  ;;  %46 = vperm.xlu0 %588, %v38_v33  }
  0x13   :  { %385 = vmatprep.mubr.f32.mxu1 %v590_v3 }
  0x14   :  { %536 = vmatmul.mubr.msk.f32.gmra.mrb[6].mxu0 %vm49_vm3, %v18_v31 }
  0x15   :  { %552 = vmatprep.mubr.msk.f32.mxu0 %vm49_vm3, %v17_v17 }
  0x16   :  { %540 = vmatmul.mubr.msk.f32.gmra.mrb[6].mxu1 %vm49_vm3, %v18_v31 }
  0x18   :  { %553 = vmatmul.mubr.msk.f32.vlgmr.msra.gmra.mrb[8].mxu0 %vm49_vm3, %v18_v31  ;;  %v483_v31 = vld [vmem:[%s850_s3 + $0x80] sm:$0x3] }
  0x8c   :  { %v717_v34 = vpop.permute.xlu0 %41 }
  0x91   :  { %v730_v43 = vpop.permute.xlu0 %46 }
  0xdb   :  { %v150_v35 = vpop.f32.mrb[0].mxu0 }
  0xdc   :  { %v151_v37 = vadd.f32 %v150_v35, %v717_v34  ;;  %v152_v38 = vpop.f32.mrb[1].mxu0 }
  0xdd   :  { %v153_v40 = vadd.f32 %v152_v38, %v717_v34  ;;  %v227_v41 = vpop.f32.mrb[0].mxu1 }
  0xde   :  { %v485_v44 = vadd.f32 %v467_v36, %v151_v37  ;;  %v228_v45 = vadd.f32 %v227_v41, %v717_v34  ;;  %v229_v46 = vpop.f32.mrb[1].mxu1  ;;  %v484_v36 = vld [vmem:[%s850_s3 + $0x88] sm:$0x3] }
  0xdf   :  { %v486_v48 = vadd.f32 %v468_v39, %v153_v40  ;;  %v156_v49 = vpop.f32.mrb[2].mxu0  ;;  %v230_v51 = vadd.f32 %v229_v46, %v717_v34  ;;  %v475_v40 = vld [vmem:[%s850_s3 + $0x40] sm:$0xff] }
  0xe0   :  { %503 = vst [vmem:[%s851_s4] sm:$0xff] %v485_v44  ;;  %v487_v52 = vadd.f32 %v469_v42, %v228_v45  ;;  %v157_v53 = vadd.f32 %v156_v49, %v730_v43  ;;  %v158_v54 = vpop.f32.mrb[3].mxu0 }
  0xe1   :  { %504 = vst [vmem:[%s851_s4 + $0x8] sm:$0xff] %v486_v48  ;;  %v159_v56 = vadd.f32 %v158_v54, %v730_v43  ;;  %v488_v57 = vadd.f32 %v470_v47, %v230_v51  ;;  %v233_v58 = vpop.f32.mrb[2].mxu1 }
  0xe2   :  { %505 = vst [vmem:[%s851_s4 + $0x10] sm:$0xff] %v487_v52  ;;  %v494_v60 = vadd.f32 %v476_v50, %v157_v53  ;;  %v234_v61 = vadd.f32 %v233_v58, %v730_v43  ;;  %v235_v62 = vpop.f32.mrb[3].mxu1 }
  0xe3   :  { %v495_v0 = vadd.f32 %v477_v55, %v159_v56  ;;  %506 = vst [vmem:[%s851_s4 + $0x18] sm:$0xff] %v488_v57  ;;  %v304_v1 = vpop.f32.mrb[4].mxu0  ;;  %v236_v3 = vadd.f32 %v235_v62, %v730_v43 }
  0xe4   :  { %512 = vst [vmem:[%s851_s4 + $0x48] sm:$0x3] %v494_v60  ;;  %v496_v4 = vadd.f32 %v478_v59, %v234_v61  ;;  %v305_v5 = vadd.f32 %v304_v1, %v717_v34  ;;  %v306_v6 = vpop.f32.mrb[5].mxu0 }
  0xe5   :  { %513 = vst [vmem:[%s851_s4 + $0x50] sm:$0x3] %v495_v0  ;;  %v497_v8 = vadd.f32 %v479_v63, %v236_v3  ;;  %v307_v9 = vadd.f32 %v306_v6, %v717_v34  ;;  %v381_v10 = vpop.f32.mrb[4].mxu1 }
  0xe6   :  { %514 = vst [vmem:[%s851_s4 + $0x58] sm:$0x3] %v496_v4  ;;  %v489_v12 = vadd.f32 %v471_v2, %v305_v5  ;;  %v382_v13 = vadd.f32 %v381_v10, %v717_v34  ;;  %v383_v14 = vpop.f32.mrb[5].mxu1 }
  0xe7   :  { %515 = vst [vmem:[%s851_s4 + $0x60] sm:$0x3] %v497_v8  ;;  %v490_v16 = vadd.f32 %v472_v7, %v307_v9  ;;  %v310_v17 = vpop.f32.mrb[6].mxu0  ;;  %v384_v19 = vadd.f32 %v383_v14, %v717_v34 }
  0xe8   :  { %507 = vst [vmem:[%s851_s4 + $0x20] sm:$0xff] %v489_v12  ;;  %v491_v20 = vadd.f32 %v473_v11, %v382_v13  ;;  %v311_v21 = vadd.f32 %v310_v17, %v730_v43  ;;  %v312_v22 = vpop.f32.mrb[7].mxu0 }
  0xe9   :  { %508 = vst [vmem:[%s851_s4 + $0x28] sm:$0xff] %v490_v16  ;;  %v492_v24 = vadd.f32 %v474_v15, %v384_v19  ;;  %v313_v25 = vadd.f32 %v312_v22, %v730_v43  ;;  %v387_v26 = vpop.f32.mrb[6].mxu1 }
  0xea   :  { %509 = vst [vmem:[%s851_s4 + $0x30] sm:$0xff] %v491_v20  ;;  %v498_v28 = vadd.f32 %v480_v18, %v311_v21  ;;  %v388_v29 = vadd.f32 %v387_v26, %v730_v43  ;;  %v389_v30 = vpop.f32.mrb[7].mxu1 }
  0xeb   :  { %510 = vst [vmem:[%s851_s4 + $0x38] sm:$0xff] %v492_v24  ;;  %v499_v32 = vadd.f32 %v481_v23, %v313_v25  ;;  %v390_v33 = vadd.f32 %v389_v30, %v730_v43  ;;  %v554_v35 = vpop.f32.mrb[8].mxu0 }
  0xec   :  { %516 = vst [vmem:[%s851_s4 + $0x68] sm:$0x3] %v498_v28  ;;  %v500_v37 = vadd.f32 %v482_v27, %v388_v29  ;;  %v464_v38 = vadd.f32 %v554_v35, %v730_v43  ;;  %v458_v39 = vpop.f32.mrb[9].mxu0 }
  0xed   :  { %517 = vst [vmem:[%s851_s4 + $0x70] sm:$0x3] %v499_v32  ;;  %v501_v41 = vadd.f32 %v483_v31, %v390_v33  ;;  %v459_v42 = vadd.f32 %v458_v39, %v717_v34 }
  0xee   :  { %518 = vst [vmem:[%s851_s4 + $0x78] sm:$0x3] %v500_v37  ;;  %v502_v44 = vadd.f32 %v484_v36, %v464_v38 }
  0xef   :  { %519 = vst [vmem:[%s851_s4 + $0x80] sm:$0x3] %v501_v41  ;;  %v493_v43 = vadd.f32 %v475_v40, %v459_v42 }
  0xf0   :  { %520 = vst [vmem:[%s851_s4 + $0x88] sm:$0x3] %v502_v44 }
  0xf1   :  { %511 = vst [vmem:[%s851_s4 + $0x40] sm:$0xff] %v493_v43 }

</bundles_post_ra>
